<compile_context>
chip_gen: v7x
topology: tpu7x:2x2x1
jax: 0.10.0
libtpu: 0.0.40
codegen_flags: <defaults>
</compile_context>

<pallas_src>
import functools

import jax
import jax.numpy as jnp
from jax.experimental import pallas as pl
from jax.experimental.pallas import tpu as pltpu


def _act(name):
    if name == "tanh":
        return jnp.tanh
    return lambda v: v  # nn.Identity()


def _round_up(n, m):
    return ((n + m - 1) // m) * m


def _pad2(a, rows, cols):
    return jnp.pad(a, ((0, rows - a.shape[0]), (0, cols - a.shape[1])))


# ---------------------------------------------------------------------------
# Deterministic parameter construction (matches PNNLinearBlock.__init__ shapes)
# ---------------------------------------------------------------------------
def _linear(key, n_in, n_out):
    k1, k2 = jax.random.split(key)
    scale = 1.0 / jnp.sqrt(jnp.float32(n_in))
    w = jax.random.uniform(k1, (n_in, n_out), jnp.float32, -scale, scale)
    b = jax.random.uniform(k2, (1, n_out), jnp.float32, -scale, scale)
    return w, b


def _make_block(key, col, depth, n_in, n_out, alpha):
    kW, kU, kV = jax.random.split(key, 3)
    p = {}
    p["Ww"], p["Wb"] = _linear(kW, n_in, n_out)
    if depth > 0:
        p["Uw"], p["Ub"] = _linear(kU, n_in, n_out)
        if col > 0:
            vkeys = jax.random.split(kV, col)
            vws, vbs = zip(*[_linear(vkeys[j], n_in, n_in) for j in range(col)])
            p["Vw"] = jnp.stack(vws)                      # (col, n_in, n_in)
            p["Vb"] = jnp.stack(vbs)                      # (col, 1, n_in)
            p["alpha"] = jnp.full((col,), alpha, jnp.float32)
    return p


def init_pnn_params(key, obs_dim, fc_hiddens, num_outputs, num_cols, alpha_value=0.01):
    columns = []
    col_keys = jax.random.split(key, num_cols)
    layer_dims = [obs_dim] + list(fc_hiddens)
    n_hiddens = len(fc_hiddens)
    for c in range(num_cols):
        lkeys = jax.random.split(col_keys[c], n_hiddens + 2)
        layers = []
        for l in range(n_hiddens):
            layers.append(_make_block(lkeys[l], c, l,
                                      layer_dims[l], layer_dims[l + 1], alpha_value))
        head_in = layer_dims[-1]
        logits_p = _make_block(lkeys[n_hiddens], c, n_hiddens, head_in,
                               num_outputs, alpha_value)
        value_p = _make_block(lkeys[n_hiddens + 1], c, n_hiddens, head_in,
                              1, alpha_value)
        columns.append({"layers": layers, "logits": logits_p, "value": value_p})
    return columns


# ---------------------------------------------------------------------------
# Pure-JAX reference (mirrors the torch PNN.forward loop, unfused)
# ---------------------------------------------------------------------------
def _ref_block(p, inputs, act_name):
    act = _act(act_name)
    x = inputs[-1]
    cur = x @ p["Ww"] + p["Wb"]
    if "Vw" in p:
        prev = None
        for j in range(p["Vw"].shape[0]):
            vj = (inputs[j] * p["alpha"][j]) @ p["Vw"][j] + p["Vb"][j]
            prev = vj if prev is None else prev + vj
        return act(cur + act(prev) @ p["Uw"] + p["Ub"])
    return act(cur)


def pnn_forward_ref(columns, x, cur_task_id, act_name="tanh"):
    C = cur_task_id + 1
    L = len(columns[0]["layers"])
    inputs = [x] * C
    for l in range(L):
        inputs = [_ref_block(columns[c]["layers"][l], inputs[:c + 1], act_name)
                  for c in range(C)]
    logits = _ref_block(columns[C - 1]["logits"], inputs[:C], None)
    value = _ref_block(columns[C - 1]["value"], inputs[:C], None)
    return logits, value[:, 0]


# ---------------------------------------------------------------------------
# Slab packer: many small matrices -> one lane-dense VMEM slab per lane width
# ---------------------------------------------------------------------------
class _SlabPacker:
    """Stacks 2-D arrays along rows into one slab per distinct lane width.

    Every entry keeps rows % 8 == 0 and width % 128 == 0, so in-kernel static
    row slices are sublane/lane aligned (no relayout, zero-cost views).
    """

    def __init__(self, dtype):
        self.dtype = dtype
        self.groups = {}      # width -> list of arrays
        self.offsets = {}     # width -> next row offset
        self.elems = 0        # total rows*width (for flop estimates)

    def add(self, a):
        rows, width = a.shape
        assert rows % 8 == 0 and width % 128 == 0
        off = self.offsets.get(width, 0)
        self.groups.setdefault(width, []).append(a.astype(self.dtype))
        self.offsets[width] = off + rows
        self.elems += rows * width
        return (width, off, rows)          # static handle

    def add_bias(self, a):
        # (1, width) bias -> 8-row zero-padded record; kernel reads row 0.
        return self.add(jnp.pad(a, ((0, 7), (0, 0))))

    def finalize(self, flat):
        index = {}
        for width, arrs in self.groups.items():
            flat.append(jnp.concatenate(arrs, axis=0))
            index[width] = len(flat) - 1
        return index


# ---------------------------------------------------------------------------
# Fused-parameter preparation (all algebraic folding + padding done here)
# ---------------------------------------------------------------------------
def prepare_fused_params(columns, cur_task_id, compute_dtype=jnp.float32):
    C = cur_task_id + 1
    L = len(columns[0]["layers"])
    assert L >= 1, "fcnet_hiddens must be non-empty in this configuration"

    dims = [columns[0]["layers"][0]["Ww"].shape[0]]
    for l in range(L):
        dims.append(columns[0]["layers"][l]["Ww"].shape[1])
    dims_p = [_round_up(d, 128) for d in dims]          # lane-padded widths

    wpack = _SlabPacker(compute_dtype)                  # matmul weights
    bpack = _SlabPacker(jnp.float32)                    # biases stay f32
    transc_per_row = 0

    # ---- layer 0: every column is 'plain' and consumes the same x ----------
    Pk0, Pn1 = dims_p[0], dims_p[1]
    Wcat = jnp.concatenate([_pad2(columns[c]["layers"][0]["Ww"], Pk0, Pn1)
                            for c in range(C)], axis=1)
    bcat = jnp.concatenate([_pad2(columns[c]["layers"][0]["Wb"], 1, Pn1)
                            for c in range(C)], axis=1)
    layer0 = dict(W=wpack.add(Wcat), b=bpack.add_bias(bcat), col_width=Pn1)
    transc_per_row += C * Pn1

    # ---- hidden layers >= 1 -------------------------------------------------
    layers_meta = []
    for l in range(1, L):
        Pk, Pn = dims_p[l], dims_p[l + 1]
        row = []
        for c in range(C):
            p = columns[c]["layers"][l]
            if "Vw" not in p:                           # column 0: plain
                row.append(dict(kind="plain",
                                W=wpack.add(_pad2(p["Ww"], Pk, Pn)),
                                b=bpack.add_bias(_pad2(p["Wb"], 1, Pn))))
                transc_per_row += Pn
            else:                                       # lateral adapters
                # fold alpha into V:  (a*x) @ V == x @ (a*V);  bias unscaled.
                Vs = [wpack.add(_pad2(p["alpha"][j] * p["Vw"][j], Pk, Pk))
                      for j in range(c)]
                row.append(dict(
                    kind="lateral", V=Vs,
                    Vb=bpack.add_bias(_pad2(jnp.sum(p["Vb"], axis=0), 1, Pk)),
                    W=wpack.add(_pad2(p["Ww"], Pk, Pn)),
                    U=wpack.add(_pad2(p["Uw"], Pk, Pn)),
                    b=bpack.add_bias(_pad2(p["Wb"] + p["Ub"], 1, Pn))))
                transc_per_row += Pk + Pn
        layers_meta.append(row)

    # ---- merged logits|value head, active column only, lane-padded ---------
    Pk = dims_p[-1]
    p_log, p_val = columns[C - 1]["logits"], columns[C - 1]["value"]
    n_log = p_log["Ww"].shape[1]
    n_val = p_val["Ww"].shape[1]
    assert n_val == 1, "value head must be 1-wide (out[:, n_logits] slicing)"
    n_head = n_log + n_val
    P = _round_up(max(n_head, 128), 128)                # 128-wide output slab

    W_head = _pad2(jnp.concatenate([p_log["Ww"], p_val["Ww"]], axis=1), Pk, P)
    if "Vw" in p_log:                                   # C >= 2: lateral head
        Vs = []
        for j in range(C - 1):
            vl = _pad2(p_log["alpha"][j] * p_log["Vw"][j], Pk, Pk)
            vv = _pad2(p_val["alpha"][j] * p_val["Vw"][j], Pk, Pk)
            Vs.append(wpack.add(jnp.concatenate([vl, vv], axis=1)))  # (Pk, 2Pk)
        Vb = jnp.concatenate([_pad2(jnp.sum(p_log["Vb"], axis=0), 1, Pk),
                              _pad2(jnp.sum(p_val["Vb"], axis=0), 1, Pk)],
                             axis=1)                                  # (1, 2Pk)
        hid_l = p_log["Uw"].shape[0]
        hid_v = p_val["Uw"].shape[0]
        U_bd = jnp.zeros((2 * Pk, P), jnp.float32)       # block-diag [Ul; Uv]
        U_bd = U_bd.at[:hid_l, :n_log].set(p_log["Uw"])
        U_bd = U_bd.at[Pk:Pk + hid_v, n_log:n_head].set(p_val["Uw"])
        bias = _pad2(jnp.concatenate([p_log["Wb"] + p_log["Ub"],
                                      p_val["Wb"] + p_val["Ub"]], axis=1), 1, P)
        head = dict(kind="lateral", W=wpack.add(W_head), V=Vs,
                    Vb=bpack.add_bias(Vb), U=wpack.add(U_bd),
                    b=bpack.add_bias(bias))
    else:                                               # C == 1: plain head
        bias = _pad2(jnp.concatenate([p_log["Wb"], p_val["Wb"]], axis=1), 1, P)
        head = dict(kind="plain", W=wpack.add(W_head), b=bpack.add_bias(bias))

    flat = []
    w_index = wpack.finalize(flat)
    b_index = bpack.finalize(flat)

    meta = dict(C=C, L=L, dims_p=dims_p, P=P, n_logits=n_log,
                layer0=layer0, layers=layers_meta, head=head,
                w_index=w_index, b_index=b_index,
                flops_per_row=2 * wpack.elems,
                transc_per_row=transc_per_row)
    return flat, meta


# ---------------------------------------------------------------------------
# Fused Pallas kernel (whole PNN forward in one pallas_call)
# ---------------------------------------------------------------------------
def _build_fused_kernel(meta, act_name, compute_dtype):
    act = _act(act_name)
    C = meta["C"]
    w_index, b_index = meta["w_index"], meta["b_index"]

    def kernel(*refs):
        x_ref, wrefs, out_ref = refs[0], refs[1:-1], refs[-1]

        def W(h):                       # static, aligned row slice of a slab
            width, off, rows = h
            return wrefs[w_index[width]][off:off + rows, :]

        def Bias(h):                    # (1, width) row, f32
            width, off, _ = h
            return wrefs[b_index[width]][off:off + 1, :]

        def mm(a, h):                   # MXU dot with f32 accumulation
            return jnp.dot(a, W(h), preferred_element_type=jnp.float32)

        x = x_ref[...]                  # already compute_dtype, lane-padded

        # layer 0: one wide matmul shared by every column; split with
        # 128-aligned static lane slices (no relayout, no concat).
        l0 = meta["layer0"]
        cw = l0["col_width"]
        y0 = mm(x, l0["W"]) + Bias(l0["b"])
        inputs = [act(y0[:, c * cw:(c + 1) * cw]).astype(compute_dtype)
                  for c in range(C)]

        # hidden layers >= 1: accumulated dots, no lane-axis concatenation.
        for row in meta["layers"]:
            outs = []
            for c, blk in enumerate(row):
                if blk["kind"] == "plain":
                    y = mm(inputs[c], blk["W"]) + Bias(blk["b"])
                else:
                    prev = mm(inputs[0], blk["V"][0])
                    for j in range(1, c):
                        prev = prev + mm(inputs[j], blk["V"][j])
                    prev = act(prev + Bias(blk["Vb"])).astype(compute_dtype)
                    y = (mm(inputs[c], blk["W"]) + mm(prev, blk["U"])
                         + Bias(blk["b"]))
                outs.append(act(y).astype(compute_dtype))
            inputs = outs

        # merged logits|value head of the active column (identity activation).
        hd = meta["head"]
        out = mm(inputs[C - 1], hd["W"])
        if hd["kind"] == "lateral":
            prev = mm(inputs[0], hd["V"][0])
            for j in range(1, C - 1):
                prev = prev + mm(inputs[j], hd["V"][j])
            prev = (prev + Bias(hd["Vb"])).astype(compute_dtype)
            out = out + mm(prev, hd["U"])
        out_ref[...] = (out + Bias(hd["b"])).astype(out_ref.dtype)

    return kernel


def _pick_batch_tile(B):
    # <=128 rows: one sublane-aligned tile.  Larger batches: favour 128/256-row
    # tiles so there are always >=2 grid steps (v7x has two TensorCores and
    # dimension_semantics=("parallel",) only helps with >=2 steps) and the
    # live per-column activation footprint stays small.
    if B <= 128:
        return _round_up(max(B, 8), 8)
    if B <= 256:
        return 128
    if B % 256 == 0 or B > 1024:
        return 256
    return 128


def pnn_forward_fused(x, flat_params, meta, act_name="tanh",
                      compute_dtype=jnp.float32):
    """Whole-network PNN forward in a single fused pallas_call."""
    B, obs_dim = x.shape
    Pk0, P = meta["dims_p"][0], meta["P"]

    bt = _pick_batch_tile(B)
    Bp = _round_up(B, bt)
    grid = (Bp // bt,)

    # Pad batch rows + feature lanes once, and cast to the compute dtype so
    # the per-step input DMA is already at compute precision.
    xp = jnp.pad(x, ((0, Bp - B), (0, Pk0 - obs_dim))).astype(compute_dtype)

    # Weight/bias slabs: whole-array VMEM residents (single copy, no per-step
    # double buffering, no per-array DMA/pipeline bookkeeping).
    resident_spec = pl.BlockSpec(memory_space=pltpu.MemorySpace.VMEM)
    in_specs = [pl.BlockSpec((bt, Pk0), lambda i: (i, 0))]
    in_specs += [resident_spec for _ in flat_params]
    out_specs = pl.BlockSpec((bt, P), lambda i: (i, 0))

    # VMEM budget from actual residents: weights (1 buffer) + double-buffered
    # x/out tiles + headroom for per-layer temporaries.  Clamped so small
    # configs stay well under v7x's 64 MiB while large tiles remain legal on
    # v5e/v6e's 128 MiB.
    itemsize = jnp.dtype(compute_dtype).itemsize
    w_bytes = sum(int(a.size) * a.dtype.itemsize for a in flat_params)
    io_bytes = 2 * bt * Pk0 * itemsize + 2 * bt * P * 4
    tmp_bytes = 8 * meta["C"] * bt * max(meta["dims_p"]) * 4
    vmem_limit = int(min(max(w_bytes + io_bytes + tmp_bytes + (4 << 20),
                             16 << 20), 112 << 20))

    flops = meta["flops_per_row"] * Bp
    transc = meta["transc_per_row"] * Bp if act_name == "tanh" else 0
    bytes_accessed = int(xp.size) * itemsize + w_bytes + Bp * P * 4

    kernel = _build_fused_kernel(meta, act_name, compute_dtype)
    out = pl.pallas_call(
        kernel,
        out_shape=jax.ShapeDtypeStruct((Bp, P), jnp.float32),
        grid=grid,
        in_specs=in_specs,
        out_specs=out_specs,
        compiler_params=pltpu.CompilerParams(
            dimension_semantics=("parallel",),
            vmem_limit_bytes=vmem_limit),
        cost_estimate=pl.CostEstimate(flops=flops, transcendentals=transc,
                                      bytes_accessed=bytes_accessed),
    )(xp, *flat_params)

    n_log = meta["n_logits"]
    logits = out[:B, :n_log]
    value = out[:B, n_log]          # torch: values[task].squeeze(1)
    return logits, value


# ---------------------------------------------------------------------------
if __name__ == "__main__":
    key = jax.random.PRNGKey(0)
    kp, kx = jax.random.split(key)

    B, obs_dim, hidden, num_outputs = 2, 16, 32, 6
    num_cols = 2          # two tasks -> second column has lateral adapters
    cur_task_id = 1       # forward through the newest column (active_cols = 2)

    columns = init_pnn_params(kp, obs_dim, [hidden, hidden], num_outputs,
                              num_cols, alpha_value=0.01)
    x = jax.random.normal(kx, (B, obs_dim), jnp.float32)   # obs_flat

    # pure-JAX reference (mirrors the torch loop, unfused, f32)
    ref_logits, ref_value = pnn_forward_ref(columns, x, cur_task_id)

    # fused Pallas kernel, f32 compute (recommended default; always on v5e)
    flat32, meta32 = prepare_fused_params(columns, cur_task_id,
                                          compute_dtype=jnp.float32)
    fwd32 = jax.jit(functools.partial(pnn_forward_fused, meta=meta32,
                                      act_name="tanh",
                                      compute_dtype=jnp.float32))
    logits, value = jax.block_until_ready(fwd32(x, flat32))
    assert logits.shape == (B, num_outputs) and value.shape == (B,)
    assert jnp.allclose(logits, ref_logits, atol=1e-4, rtol=1e-4)
    assert jnp.allclose(value, ref_value, atol=1e-4, rtol=1e-4)

    # bf16 compute path (v6e/v7x MXU): bf16 weights/activations, f32 accumulate
    flat16, meta16 = prepare_fused_params(columns, cur_task_id,
                                          compute_dtype=jnp.bfloat16)
    fwd16 = jax.jit(functools.partial(pnn_forward_fused, meta=meta16,
                                      act_name="tanh",
                                      compute_dtype=jnp.bfloat16))
    logits16, value16 = jax.block_until_ready(fwd16(x, flat16))
    assert jnp.allclose(logits16, ref_logits, atol=5e-2, rtol=5e-2)
    assert jnp.allclose(value16, ref_value, atol=5e-2, rtol=5e-2)

    print("KERNEL_OK")
</pallas_src>

<mosaic_0001>
module attributes {stable_mosaic.version = 11 : i64} {
  func.func @kernel(%arg0: i32, %arg1: memref<8x128xf32, #tpu.memory_space<vmem>>, %arg2: memref<256x256xf32, #tpu.memory_space<vmem>>, %arg3: memref<896x128xf32, #tpu.memory_space<vmem>>, %arg4: memref<16x256xf32, #tpu.memory_space<vmem>>, %arg5: memref<32x128xf32, #tpu.memory_space<vmem>>, %arg6: memref<8x128xf32, #tpu.memory_space<vmem>>) attributes {dimension_semantics = [#tpu.dimension_semantics<parallel>], iteration_bounds = array<i64: 1>, scalar_prefetch = 0 : i64, scratch_operands = 0 : i64, tpu.core_type = #tpu.core_type<tc>, window_params = [{transform_indices = @transform_0, window_bounds = array<i64: 8, 128>}, {pipeline_mode = #tpu.pipeline_mode<synchronous>, transform_indices = @transform_1, window_bounds = array<i64: 256, 256>}, {pipeline_mode = #tpu.pipeline_mode<synchronous>, transform_indices = @transform_2, window_bounds = array<i64: 896, 128>}, {pipeline_mode = #tpu.pipeline_mode<synchronous>, transform_indices = @transform_3, window_bounds = array<i64: 16, 256>}, {pipeline_mode = #tpu.pipeline_mode<synchronous>, transform_indices = @transform_4, window_bounds = array<i64: 32, 128>}, {transform_indices = @transform_5, window_bounds = array<i64: 8, 128>}]} {
    %c0 = arith.constant 0 : index
    %c0_0 = arith.constant 0 : index
    %0 = vector.load %arg1[%c0, %c0_0] : memref<8x128xf32, #tpu.memory_space<vmem>>, vector<8x128xf32>
    %c0_1 = arith.constant 0 : index
    %c0_2 = arith.constant 0 : index
    %1 = vector.load %arg2[%c0_1, %c0_2] : memref<256x256xf32, #tpu.memory_space<vmem>>, vector<128x256xf32>
    %cst = arith.constant dense<0.000000e+00> : vector<8x256xf32>
    %2 = tpu.matmul %0, %1, %cst {dimension_numbers = #tpu.dot_dimension_numbers<[1], [0], [0], [1], [0, 0, 1, 1], [], []>} : vector<8x128xf32>, vector<128x256xf32>, vector<8x256xf32> -> vector<8x256xf32>
    %c0_3 = arith.constant 0 : index
    %c0_4 = arith.constant 0 : index
    %3 = vector.load %arg4[%c0_3, %c0_4] : memref<16x256xf32, #tpu.memory_space<vmem>>, vector<1x256xf32>
    %4 = vector.broadcast %3 : vector<1x256xf32> to vector<8x256xf32>
    %5 = arith.addf %2, %4 : vector<8x256xf32>
    %6 = vector.extract_strided_slice %5 {offsets = [0, 0], sizes = [8, 128], strides = [1, 1]} : vector<8x256xf32> to vector<8x128xf32>
    %7 = math.tanh %6 : vector<8x128xf32>
    %8 = vector.extract_strided_slice %5 {offsets = [0, 128], sizes = [8, 128], strides = [1, 1]} : vector<8x256xf32> to vector<8x128xf32>
    %9 = math.tanh %8 : vector<8x128xf32>
    %c0_5 = arith.constant 0 : index
    %c0_6 = arith.constant 0 : index
    %10 = vector.load %arg3[%c0_5, %c0_6] : memref<896x128xf32, #tpu.memory_space<vmem>>, vector<128x128xf32>
    %cst_7 = arith.constant dense<0.000000e+00> : vector<8x128xf32>
    %11 = tpu.matmul %7, %10, %cst_7 {dimension_numbers = #tpu.dot_dimension_numbers<[1], [0], [0], [1], [0, 0, 1, 1], [], []>} : vector<8x128xf32>, vector<128x128xf32>, vector<8x128xf32> -> vector<8x128xf32>
    %c0_8 = arith.constant 0 : index
    %c0_9 = arith.constant 0 : index
    %12 = vector.load %arg5[%c0_8, %c0_9] : memref<32x128xf32, #tpu.memory_space<vmem>>, vector<1x128xf32>
    %13 = vector.broadcast %12 : vector<1x128xf32> to vector<8x128xf32>
    %14 = arith.addf %11, %13 : vector<8x128xf32>
    %15 = math.tanh %14 : vector<8x128xf32>
    %c128 = arith.constant 128 : index
    %c0_10 = arith.constant 0 : index
    %16 = vector.load %arg3[%c128, %c0_10] : memref<896x128xf32, #tpu.memory_space<vmem>>, vector<128x128xf32>
    %cst_11 = arith.constant dense<0.000000e+00> : vector<8x128xf32>
    %17 = tpu.matmul %7, %16, %cst_11 {dimension_numbers = #tpu.dot_dimension_numbers<[1], [0], [0], [1], [0, 0, 1, 1], [], []>} : vector<8x128xf32>, vector<128x128xf32>, vector<8x128xf32> -> vector<8x128xf32>
    %c8 = arith.constant 8 : index
    %c0_12 = arith.constant 0 : index
    %18 = vector.load %arg5[%c8, %c0_12] : memref<32x128xf32, #tpu.memory_space<vmem>>, vector<1x128xf32>
    %19 = vector.broadcast %18 : vector<1x128xf32> to vector<8x128xf32>
    %20 = arith.addf %17, %19 : vector<8x128xf32>
    %21 = math.tanh %20 : vector<8x128xf32>
    %c256 = arith.constant 256 : index
    %c0_13 = arith.constant 0 : index
    %22 = vector.load %arg3[%c256, %c0_13] : memref<896x128xf32, #tpu.memory_space<vmem>>, vector<128x128xf32>
    %cst_14 = arith.constant dense<0.000000e+00> : vector<8x128xf32>
    %23 = tpu.matmul %9, %22, %cst_14 {dimension_numbers = #tpu.dot_dimension_numbers<[1], [0], [0], [1], [0, 0, 1, 1], [], []>} : vector<8x128xf32>, vector<128x128xf32>, vector<8x128xf32> -> vector<8x128xf32>
    %c384 = arith.constant 384 : index
    %c0_15 = arith.constant 0 : index
    %24 = vector.load %arg3[%c384, %c0_15] : memref<896x128xf32, #tpu.memory_space<vmem>>, vector<128x128xf32>
    %cst_16 = arith.constant dense<0.000000e+00> : vector<8x128xf32>
    %25 = tpu.matmul %21, %24, %cst_16 {dimension_numbers = #tpu.dot_dimension_numbers<[1], [0], [0], [1], [0, 0, 1, 1], [], []>} : vector<8x128xf32>, vector<128x128xf32>, vector<8x128xf32> -> vector<8x128xf32>
    %26 = arith.addf %23, %25 : vector<8x128xf32>
    %c16 = arith.constant 16 : index
    %c0_17 = arith.constant 0 : index
    %27 = vector.load %arg5[%c16, %c0_17] : memref<32x128xf32, #tpu.memory_space<vmem>>, vector<1x128xf32>
    %28 = vector.broadcast %27 : vector<1x128xf32> to vector<8x128xf32>
    %29 = arith.addf %26, %28 : vector<8x128xf32>
    %30 = math.tanh %29 : vector<8x128xf32>
    %c512 = arith.constant 512 : index
    %c0_18 = arith.constant 0 : index
    %31 = vector.load %arg3[%c512, %c0_18] : memref<896x128xf32, #tpu.memory_space<vmem>>, vector<128x128xf32>
    %cst_19 = arith.constant dense<0.000000e+00> : vector<8x128xf32>
    %32 = tpu.matmul %30, %31, %cst_19 {dimension_numbers = #tpu.dot_dimension_numbers<[1], [0], [0], [1], [0, 0, 1, 1], [], []>} : vector<8x128xf32>, vector<128x128xf32>, vector<8x128xf32> -> vector<8x128xf32>
    %c128_20 = arith.constant 128 : index
    %c0_21 = arith.constant 0 : index
    %33 = vector.load %arg2[%c128_20, %c0_21] : memref<256x256xf32, #tpu.memory_space<vmem>>, vector<128x256xf32>
    %cst_22 = arith.constant dense<0.000000e+00> : vector<8x256xf32>
    %34 = tpu.matmul %15, %33, %cst_22 {dimension_numbers = #tpu.dot_dimension_numbers<[1], [0], [0], [1], [0, 0, 1, 1], [], []>} : vector<8x128xf32>, vector<128x256xf32>, vector<8x256xf32> -> vector<8x256xf32>
    %c8_23 = arith.constant 8 : index
    %c0_24 = arith.constant 0 : index
    %35 = vector.load %arg4[%c8_23, %c0_24] : memref<16x256xf32, #tpu.memory_space<vmem>>, vector<1x256xf32>
    %36 = vector.broadcast %35 : vector<1x256xf32> to vector<8x256xf32>
    %37 = arith.addf %34, %36 : vector<8x256xf32>
    %c640 = arith.constant 640 : index
    %c0_25 = arith.constant 0 : index
    %38 = vector.load %arg3[%c640, %c0_25] : memref<896x128xf32, #tpu.memory_space<vmem>>, vector<256x128xf32>
    %cst_26 = arith.constant dense<0.000000e+00> : vector<8x128xf32>
    %39 = tpu.matmul %37, %38, %cst_26 {dimension_numbers = #tpu.dot_dimension_numbers<[1], [0], [0], [1], [0, 0, 1, 1], [], []>} : vector<8x256xf32>, vector<256x128xf32>, vector<8x128xf32> -> vector<8x128xf32>
    %40 = arith.addf %32, %39 : vector<8x128xf32>
    %c24 = arith.constant 24 : index
    %c0_27 = arith.constant 0 : index
    %41 = vector.load %arg5[%c24, %c0_27] : memref<32x128xf32, #tpu.memory_space<vmem>>, vector<1x128xf32>
    %42 = vector.broadcast %41 : vector<1x128xf32> to vector<8x128xf32>
    %43 = arith.addf %40, %42 : vector<8x128xf32>
    %c0_28 = arith.constant 0 : index
    %c0_29 = arith.constant 0 : index
    %44 = vector.load %arg6[%c0_28, %c0_29] : memref<8x128xf32, #tpu.memory_space<vmem>>, vector<8x128xf32>
    tpu.vector_store %arg6[%c0_28, %c0_29], %43 {strides = array<i32>} : memref<8x128xf32, #tpu.memory_space<vmem>>, vector<8x128xf32>,
    return
  }
  func.func @transform_0(%arg0: i32) -> (i32, i32) {
    %c0_i32 = arith.constant 0 : i32
    %c0_i32_0 = arith.constant 0 : i32
    return %arg0, %c0_i32 : i32, i32
  }
  func.func @transform_1(%arg0: i32) -> (i32, i32) {
    %c0_i32 = arith.constant 0 : i32
    %c0_i32_0 = arith.constant 0 : i32
    %c0_i32_1 = arith.constant 0 : i32
    return %c0_i32, %c0_i32_0 : i32, i32
  }
  func.func @transform_2(%arg0: i32) -> (i32, i32) {
    %c0_i32 = arith.constant 0 : i32
    %c0_i32_0 = arith.constant 0 : i32
    %c0_i32_1 = arith.constant 0 : i32
    return %c0_i32, %c0_i32_0 : i32, i32
  }
  func.func @transform_3(%arg0: i32) -> (i32, i32) {
    %c0_i32 = arith.constant 0 : i32
    %c0_i32_0 = arith.constant 0 : i32
    %c0_i32_1 = arith.constant 0 : i32
    return %c0_i32, %c0_i32_0 : i32, i32
  }
  func.func @transform_4(%arg0: i32) -> (i32, i32) {
    %c0_i32 = arith.constant 0 : i32
    %c0_i32_0 = arith.constant 0 : i32
    %c0_i32_1 = arith.constant 0 : i32
    return %c0_i32, %c0_i32_0 : i32, i32
  }
  func.func @transform_5(%arg0: i32) -> (i32, i32) {
    %c0_i32 = arith.constant 0 : i32
    %c0_i32_0 = arith.constant 0 : i32
    return %arg0, %c0_i32 : i32, i32
  }
}

</mosaic_0001>

<bundles_post_ra>
// kernel: pnn_forward_fused.1
= control target key start
LH: loop header
LB: loop body
LE: loop exit
PB: predicated region body
PF: predicated region fallthrough
CT: control target
= control target key end

     0   :  { %10 = vsyncpa [#allocation3], 0  ;;  %s1679_s0 = inlined_call_operand.vmem [shape: f32[8,128], index: 0, kind: input, shape index: {}]   ;;  %s1680_s1 = inlined_call_operand.hbm [shape: f32[256,256], index: 1, kind: input, shape index: {}]   ;;  %s1681_s2 = inlined_call_operand.hbm [shape: f32[896,128], index: 2, kind: input, shape index: {}]   ;;  %s1682_s3 = inlined_call_operand.hbm [shape: f32[16,256], index: 3, kind: input, shape index: {}]   ;;  %s1683_s4 = inlined_call_operand.hbm [shape: f32[32,128], index: 4, kind: input, shape index: {}]   ;;  %s1684_s5 = inlined_call_operand.vmem [shape: f32[8,128], index: 5, kind: output, shape index: {}]  }
   0x1   :  { %11 = vsyncpa [#allocation5], 0 }
   0x2   :  { %12 = vsyncpa [#allocation8], 0  ;;  %s1504_s18 = smov [#allocation4]   ;;  %s1410_s22 = scalar_lea.hbm %s1681_s2, 14336 }
   0x3   :  { %s32_s19 = sshll.u32 %s1504_s18, 4  ;;  %p1411_p0 = scmp.ne.s32.totalorder %s1681_s2, %s1410_s22  ;;  %s33_s19 = int_to_ptr.vmem [resolvable:$true] %s32_s19 }
   0x4   :  { %p1414_p1 = scmp.lt.u32.totalorder %s1410_s22, %s1681_s2 }
   0x6   :  { %p1416_p2 = pnand %p1414_p1, %p1411_p0 }
   0x8   :  { %1419 = shalt.err (!%p1416_p2)
}
   0x9   :  { %s1420_s27 = scalar_lea.vmem %s33_s19, 14336  ;;  %p1425_p4 = scmp.lt.s32.totalorder %s33_s19, %s33_s19 }
   0xa   :  { %p1421_p3 = scmp.ne.s32.totalorder %s33_s19, %s1420_s27  ;;  %p1426_p5 = scmp.lt.s32.totalorder %s1420_s27, %s1420_s27 }
   0xc   :  { %p1427_p6 = por %p1426_p5, %p1425_p4 }
   0xe   :  { %p1428_p7 = pnand %p1427_p6, %p1421_p3 }
  0x10   :  { %1431 = shalt.err (!%p1428_p7)
}
  0x11   :  { %s1505_s28 = smov 128   ;;  %s1506_s29 = smov 8  }
  0x12   :  { %38 = dma.hbm_to_vmem [thread:$0]  %s1681_s2, 14336, %s33_s19, [#allocation5], %s1505_s28, %s1505_s28, %s1506_s29  }
  0x13   :  { %s1507_s7 = smov [#allocation2]   ;;  %s1432_s11 = scalar_lea.hbm %s1680_s1, 8192 }
  0x14   :  { %s20_s8 = sshll.u32 %s1507_s7, 4  ;;  %p1433_p8 = scmp.ne.s32.totalorder %s1680_s1, %s1432_s11  ;;  %s21_s8 = int_to_ptr.vmem [resolvable:$true] %s20_s8 }
  0x15   :  { %p1436_p9 = scmp.lt.u32.totalorder %s1432_s11, %s1680_s1 }
  0x17   :  { %p1438_p10 = pnand %p1436_p9, %p1433_p8 }
  0x19   :  { %1441 = shalt.err (!%p1438_p10)
}
  0x1a   :  { %s1442_s16 = scalar_lea.vmem %s21_s8, 8192  ;;  %p1447_p12 = scmp.lt.s32.totalorder %s21_s8, %s21_s8 }
  0x1b   :  { %p1443_p11 = scmp.ne.s32.totalorder %s21_s8, %s1442_s16  ;;  %p1448_p13 = scmp.lt.s32.totalorder %s1442_s16, %s1442_s16 }
  0x1d   :  { %p1449_p0 = por %p1448_p13, %p1447_p12 }
  0x1f   :  { %p1450_p1 = pnand %p1449_p0, %p1443_p11 }
  0x21   :  { %1453 = shalt.err (!%p1450_p1)
}
  0x22   :  { %s1508_s2 = smov 256   ;;  %s1509_s17 = smov 16  }
  0x23   :  { %26 = dma.hbm_to_vmem [thread:$0]  %s1680_s1, 8192, %s21_s8, [#allocation3], %s1508_s2, %s1508_s2, %s1509_s17  }
  0x24   :  { %s1510_s20 = smov [#allocation6]   ;;  %s1511_s22 = smov [#allocation7]  }
  0x25   :  { %s44_s21 = sshll.u32 %s1510_s20, 4  ;;  %s56_s23 = sshll.u32 %s1511_s22, 4  ;;  %s45_s21 = int_to_ptr.vmem [resolvable:$true] %s44_s21  ;;  %s1572_s23 = int_to_ptr.vmem [resolvable:$true] %s56_s23 }
  0x26   :  { %s1454_s26 = scalar_lea.hbm %s1682_s3, 512 }
  0x27   :  { %p1455_p2 = scmp.ne.s32.totalorder %s1682_s3, %s1454_s26  ;;  %p1458_p3 = scmp.lt.u32.totalorder %s1454_s26, %s1682_s3 }
  0x29   :  { %p1460_p4 = pnand %p1458_p3, %p1455_p2 }
  0x2b   :  { %1463 = shalt.err (!%p1460_p4)
}
  0x2c   :  { %s1464_s1 = scalar_lea.vmem %s45_s21, 512  ;;  %p1469_p6 = scmp.lt.s32.totalorder %s45_s21, %s45_s21 }
  0x2d   :  { %p1465_p5 = scmp.ne.s32.totalorder %s45_s21, %s1464_s1  ;;  %p1470_p7 = scmp.lt.s32.totalorder %s1464_s1, %s1464_s1 }
  0x2f   :  { %p1471_p8 = por %p1470_p7, %p1469_p6 }
  0x31   :  { %p1472_p9 = pnand %p1471_p8, %p1465_p5 }
  0x33   :  { %1475 = shalt.err (!%p1472_p9)
}
  0x34   :  { %50 = dma.hbm_to_vmem [thread:$0]  %s1682_s3, 512, %s45_s21, [#allocation5], %s1508_s2, %s1508_s2, %s1509_s17  }
  0x35   :  { %s1476_s12 = scalar_lea.hbm %s1683_s4, 512 }
  0x36   :  { %p1477_p10 = scmp.ne.s32.totalorder %s1683_s4, %s1476_s12  ;;  %p1480_p11 = scmp.lt.u32.totalorder %s1476_s12, %s1683_s4 }
  0x38   :  { %p1482_p12 = pnand %p1480_p11, %p1477_p10 }
  0x3a   :  { %1485 = shalt.err (!%p1482_p12)
}
  0x3b   :  { %s1486_s18 = scalar_lea.vmem %s1572_s23, 512  ;;  %p1491_p0 = scmp.lt.s32.totalorder %s1572_s23, %s1572_s23 }
  0x3c   :  { %p1487_p13 = scmp.ne.s32.totalorder %s1572_s23, %s1486_s18  ;;  %p1492_p1 = scmp.lt.s32.totalorder %s1486_s18, %s1486_s18 }
  0x3e   :  { %p1493_p2 = por %p1492_p1, %p1491_p0 }
  0x40   :  { %p1494_p3 = pnand %p1493_p2, %p1487_p13 }
  0x42   :  { %1497 = shalt.err (!%p1494_p3)
}
  0x43   :  { %62 = dma.hbm_to_vmem [thread:$0]  %s1683_s4, 512, %s1572_s23, [#allocation8], %s1505_s28, %s1505_s28, %s1506_s29  }
  0x44   :  { %1498 = dma.done.wait [#allocation3], 8192  }
  0x45   :  { %1499 = vsyncadd [#allocation3], 4294959104 }
  0x46   :  { %1500 = dma.done.wait [#allocation5], 14848  }
  0x47   :  { %1501 = vsyncadd [#allocation5], 4294952448 }
  0x48   :  { %1502 = dma.done.wait [#allocation8], 512  }
  0x49   :  { %1503 = vsyncadd [#allocation8], 4294966784  ;;  %v1512_v0 = vmov 0.0   ;;  %v1513_v1 = vmov 0.0|0.0   ;;  %v77_v2 = vld [vmem:[#allocation2 + $0x8] sm:$0xff]  ;;  %v79_v3 = vld [vmem:[#allocation2 + $0x18] sm:$0xff] }
  0x4a   :  { %184 = vmatprep.mubr.f32.mxu0 %v1512_v0  ;;  %1205 = vmatprep.subr.bf16.mxu1 %v1513_v1  ;;  %v76_v4 = vld [vmem:[#allocation2] sm:$0xff]  ;;  %v1173_v5 = vpack.c.bf16 %v79_v3, %v77_v2  ;;  %v78_v6 = vld [vmem:[#allocation2 + $0x10] sm:$0xff]  ;;  %v81_v7 = vld [vmem:[#allocation2 + $0x28] sm:$0xff]  ;;  %vm1514_vm0 = vmmov 0  }
  0x4b   :  { %v83_v8 = vld [vmem:[#allocation2 + $0x38] sm:$0xff]  ;;  %v1175_v9 = vpack.c.bf16 %v78_v6, %v76_v4  ;;  %v80_v11 = vld [vmem:[#allocation2 + $0x20] sm:$0xff]  ;;  %v82_v12 = vld [vmem:[#allocation2 + $0x30] sm:$0xff]  ;;  %1030 = vmatprep.mubr.msk.f32.mxu1 %vm1514_vm0, %v1512_v0 }
  0x4c   :  { %v1177_v10 = vpack.c.bf16 %v83_v8, %v81_v7  ;;  %v85_v13 = vld [vmem:[#allocation2 + $0x48] sm:$0xff]  ;;  %1174 = vmatprep.subr.bf16.mxu0 %v1173_v5  ;;  %v87_v14 = vld [vmem:[#allocation2 + $0x58] sm:$0xff]  ;;  %v1179_v15 = vpack.c.bf16 %v82_v12, %v80_v11  ;;  %v84_v17 = vld [vmem:[#allocation2 + $0x40] sm:$0xff] }
  0x4d   :  { %1176 = vmatpush1.bf16.msra.mxu0 %v1175_v9  ;;  %v1181_v16 = vpack.c.bf16 %v87_v14, %v85_v13  ;;  %v86_v18 = vld [vmem:[#allocation2 + $0x50] sm:$0xff]  ;;  %v89_v19 = vld [vmem:[#allocation2 + $0x68] sm:$0xff]  ;;  %v91_v20 = vld [vmem:[#allocation2 + $0x78] sm:$0xff] }
  0x4e   :  { %1178 = vmatprep.subr.bf16.mxu0 %v1177_v10  ;;  %v1183_v21 = vpack.c.bf16 %v86_v18, %v84_v17  ;;  %v1185_v22 = vpack.c.bf16 %v91_v20, %v89_v19  ;;  %v88_v23 = vld [vmem:[#allocation2 + $0x60] sm:$0xff]  ;;  %v90_v24 = vld [vmem:[#allocation2 + $0x70] sm:$0xff]  ;;  %v93_v25 = vld [vmem:[#allocation2 + $0x88] sm:$0xff] }
  0x4f   :  { %v95_v26 = vld [vmem:[#allocation2 + $0x98] sm:$0xff]  ;;  %v193_v27 = vld [vmem:[#allocation4] sm:$0xff]  ;;  %v1187_v28 = vpack.c.bf16 %v90_v24, %v88_v23  ;;  %v194_v30 = vld [vmem:[#allocation4 + $0x8] sm:$0xff] }
  0x50   :  { %v92_v29 = vld [vmem:[#allocation2 + $0x80] sm:$0xff]  ;;  %v1189_v31 = vpack.c.bf16 %v95_v26, %v93_v25  ;;  %v94_v32 = vld [vmem:[#allocation2 + $0x90] sm:$0xff]  ;;  %v1206_v33 = vpack.c.bf16 %v194_v30, %v193_v27  ;;  %v196_v35 = vld [vmem:[#allocation4 + $0x18] sm:$0xff] }
  0x51   :  { %1180 = vmatpush1.bf16.msra.mxu0 %v1179_v15  ;;  %v195_v34 = vld [vmem:[#allocation4 + $0x10] sm:$0xff]  ;;  %v97_v36 = vld [vmem:[#allocation2 + $0xa8] sm:$0xff]  ;;  %v99_v37 = vld [vmem:[#allocation2 + $0xb8] sm:$0xff]  ;;  %v1191_v39 = vpack.c.bf16 %v94_v32, %v92_v29 }
  0x52   :  { %1182 = vmatprep.subr.bf16.mxu0 %v1181_v16  ;;  %1207 = vmatpush3.bf16.msra.mxu1 %v1206_v33  ;;  %v1209_v38 = vpack.c.bf16 %v196_v35, %v195_v34  ;;  %v197_v40 = vld [vmem:[#allocation4 + $0x20] sm:$0xff]  ;;  %v198_v41 = vld [vmem:[#allocation4 + $0x28] sm:$0xff]  ;;  %v1193_v42 = vpack.c.bf16 %v99_v37, %v97_v36  ;;  %v98_v44 = vld [vmem:[#allocation2 + $0xb0] sm:$0xff]  ;;  %v110_v37 = vlaneseq }
  0x53   :  { %1208 = vmatprep.subr.bf16.mxu1 %v1513_v1  ;;  %v96_v43 = vld [vmem:[#allocation2 + $0xa0] sm:$0xff]  ;;  %v101_v45 = vld [vmem:[#allocation2 + $0xc8] sm:$0xff]  ;;  %v103_v46 = vld [vmem:[#allocation2 + $0xd8] sm:$0xff]  ;;  %v1212_v47 = vpack.c.bf16 %v198_v41, %v197_v40 }
  0x54   :  { %v1195_v48 = vpack.c.bf16 %v98_v44, %v96_v43  ;;  %v199_v49 = vld [vmem:[#allocation4 + $0x30] sm:$0xff]  ;;  %v200_v50 = vld [vmem:[#allocation4 + $0x38] sm:$0xff]  ;;  %v1197_v51 = vpack.c.bf16 %v103_v46, %v101_v45  ;;  %v100_v52 = vld [vmem:[#allocation2 + $0xc0] sm:$0xff] }
  0x55   :  { %1184 = vmatpush1.bf16.msra.mxu0 %v1183_v21  ;;  %v102_v53 = vld [vmem:[#allocation2 + $0xd0] sm:$0xff]  ;;  %v105_v54 = vld [vmem:[#allocation2 + $0xe8] sm:$0xff]  ;;  %v107_v55 = vld [vmem:[#allocation2 + $0xf8] sm:$0xff]  ;;  %v1215_v56 = vpack.c.bf16 %v200_v50, %v199_v49 }
  0x56   :  { %1186 = vmatprep.subr.bf16.mxu0 %v1185_v22  ;;  %1210 = vmatpush3.bf16.msra.mxu1 %v1209_v38  ;;  %v1199_v57 = vpack.c.bf16 %v102_v53, %v100_v52  ;;  %v201_v58 = vld [vmem:[#allocation4 + $0x40] sm:$0xff]  ;;  %v202_v59 = vld [vmem:[#allocation4 + $0x48] sm:$0xff]  ;;  %v1201_v60 = vpack.c.bf16 %v107_v55, %v105_v54  ;;  %v106_v62 = vld [vmem:[#allocation2 + $0xf0] sm:$0xff]  ;;  %v1632_v38 = vshrl.u32 %v110_v37, 7 }
  0x57   :  { %1211 = vmatprep.subr.bf16.mxu1 %v1513_v1  ;;  %v104_v61 = vld [vmem:[#allocation2 + $0xe0] sm:$0xff]  ;;  %v1218_v63 = vpack.c.bf16 %v202_v59, %v201_v58  ;;  %v286_v4 = vld [vmem:[#allocation4 + $0x88] sm:$0xff]  ;;  %v75_v5 = vld [vmem:[%s1679_s0] sm:$0xff] }
  0x58   :  { %v1203_v2 = vpack.c.bf16 %v106_v62, %v104_v61  ;;  %v285_v3 = vld [vmem:[#allocation4 + $0x80] sm:$0xff]  ;;  %v287_v7 = vld [vmem:[#allocation4 + $0x90] sm:$0xff]  ;;  %v288_v8 = vld [vmem:[#allocation4 + $0x98] sm:$0xff] }
  0x59   :  { %1188 = vmatpush1.bf16.msra.mxu0 %v1187_v28  ;;  %v1230_v6 = vpack.c.bf16 %v286_v4, %v285_v3  ;;  %v1233_v9 = vpack.c.bf16 %v288_v8, %v287_v7  ;;  %v289_v10 = vld [vmem:[#allocation4 + $0xa0] sm:$0xff]  ;;  %v290_v11 = vld [vmem:[#allocation4 + $0xa8] sm:$0xff]  ;;  %v291_v13 = vld [vmem:[#allocation4 + $0xb0] sm:$0xff] }
  0x5a   :  { %1190 = vmatprep.subr.bf16.mxu0 %v1189_v31  ;;  %1213 = vmatpush3.bf16.msra.mxu1 %v1212_v47  ;;  %v1236_v12 = vpack.c.bf16 %v290_v11, %v289_v10  ;;  %v292_v14 = vld [vmem:[#allocation4 + $0xb8] sm:$0xff]  ;;  %v293_v16 = vld [vmem:[#allocation4 + $0xc0] sm:$0xff]  ;;  %v294_v17 = vld [vmem:[#allocation4 + $0xc8] sm:$0xff] }
  0x5b   :  { %1214 = vmatprep.subr.bf16.mxu1 %v1513_v1  ;;  %v1239_v15 = vpack.c.bf16 %v292_v14, %v291_v13  ;;  %v1242_v18 = vpack.c.bf16 %v294_v17, %v293_v16  ;;  %v295_v19 = vld [vmem:[#allocation4 + $0xd0] sm:$0xff]  ;;  %v296_v20 = vld [vmem:[#allocation4 + $0xd8] sm:$0xff]  ;;  %v297_v25 = vld [vmem:[#allocation4 + $0xe0] sm:$0xff] }
  0x5c   :  { %v1245_v21 = vpack.c.bf16 %v296_v20, %v295_v19  ;;  %v203_v22 = vld [vmem:[#allocation4 + $0x50] sm:$0xff]  ;;  %v204_v23 = vld [vmem:[#allocation4 + $0x58] sm:$0xff]  ;;  %v298_v26 = vld [vmem:[#allocation4 + $0xe8] sm:$0xff] }
  0x5d   :  { %1192 = vmatpush1.bf16.msra.mxu0 %v1191_v39  ;;  %v1221_v24 = vpack.c.bf16 %v204_v23, %v203_v22  ;;  %v1248_v27 = vpack.c.bf16 %v298_v26, %v297_v25  ;;  %v205_v28 = vld [vmem:[#allocation4 + $0x60] sm:$0xff]  ;;  %v206_v29 = vld [vmem:[#allocation4 + $0x68] sm:$0xff]  ;;  %v299_v30 = vld [vmem:[#allocation4 + $0xf0] sm:$0xff]  ;;  %v112_v39 = vsub.s32 0, %v1632_v38 }
  0x5e   :  { %1194 = vmatprep.subr.bf16.mxu0 %v1193_v42  ;;  %1216 = vmatpush3.bf16.msra.mxu1 %v1215_v56  ;;  %v1224_v31 = vpack.c.bf16 %v206_v29, %v205_v28  ;;  %v300_v32 = vld [vmem:[#allocation4 + $0xf8] sm:$0xff]  ;;  %v207_v33 = vld [vmem:[#allocation4 + $0x70] sm:$0xff]  ;;  %v108_v40 = vld [vmem:[#allocation6] ss:$8 sm:$0x3] }
  0x5f   :  { %1217 = vmatprep.subr.bf16.mxu1 %v1513_v1  ;;  %v208_v34 = vld [vmem:[#allocation4 + $0x78] sm:$0xff]  ;;  %v1251_v35 = vpack.c.bf16 %v300_v32, %v299_v30  ;;  %v113_v41 = vrot.slane %v108_v40, %v112_v39  ;;  %v377_v45 = vld [vmem:[#allocation4 + $0x100] sm:$0xff]  ;;  %v378_v46 = vld [vmem:[#allocation4 + $0x108] sm:$0xff] }
  0x60   :  { %v1227_v36 = vpack.c.bf16 %v208_v34, %v207_v33  ;;  %v393_v47 = vld [vmem:[#allocation4 + $0x180] sm:$0xff]  ;;  %v1278_v49 = vpack.c.bf16 %v378_v46, %v377_v45  ;;  %v379_v50 = vld [vmem:[#allocation4 + $0x110] sm:$0xff]  ;;  %v396_v55 = vld [vmem:[#allocation4 + $0x198] sm:$0xff] }
  0x61   :  { %1196 = vmatpush1.bf16.msra.mxu0 %v1195_v48  ;;  %v394_v48 = vld [vmem:[#allocation4 + $0x188] sm:$0xff]  ;;  %v395_v54 = vld [vmem:[#allocation4 + $0x190] sm:$0xff]  ;;  %v385_v8 = vld [vmem:[#allocation4 + $0x140] sm:$0xff] }
  0x62   :  { %1198 = vmatprep.subr.bf16.mxu0 %v1197_v51  ;;  %1219 = vmatpush3.bf16.msra.mxu1 %v1218_v63  ;;  %v380_v51 = vld [vmem:[#allocation4 + $0x118] sm:$0xff]  ;;  %v1254_v52 = vpack.c.bf16 %v394_v48, %v393_v47  ;;  %v382_v58 = vld [vmem:[#allocation4 + $0x128] sm:$0xff]  ;;  %v1257_v59 = vpack.c.bf16 %v396_v55, %v395_v54  ;;  %v383_v63 = vld [vmem:[#allocation4 + $0x130] sm:$0xff] }
  0x63   :  { %1220 = vmatprep.subr.bf16.mxu1 %v1513_v1  ;;  %v1281_v56 = vpack.c.bf16 %v380_v51, %v379_v50  ;;  %v398_v61 = vld [vmem:[#allocation4 + $0x1a8] sm:$0xff]  ;;  %v399_v4 = vld [vmem:[#allocation4 + $0x1b0] sm:$0xff]  ;;  %v401_v11 = vld [vmem:[#allocation4 + $0x1c0] sm:$0xff] }
  0x64   :  { %v388_v16 = vld [vmem:[#allocation4 + $0x158] sm:$0xff]  ;;  %v389_v20 = vld [vmem:[#allocation4 + $0x160] sm:$0xff]  ;;  %v391_v23 = vld [vmem:[#allocation4 + $0x170] sm:$0xff] }
  0x65   :  { %1200 = vmatpush1.bf16.msra.mxu0 %v1199_v57  ;;  %v381_v57 = vld [vmem:[#allocation4 + $0x120] sm:$0xff]  ;;  %v404_v28 = vld [vmem:[#allocation4 + $0x1d8] sm:$0xff]  ;;  %v407_v32 = vld [vmem:[#allocation4 + $0x1f0] sm:$0xff] }
  0x66   :  { %1202 = vmatprep.subr.bf16.mxu0 %v1201_v60  ;;  %1222 = vmatpush3.bf16.msra.mxu1 %v1221_v24  ;;  %v397_v60 = vld [vmem:[#allocation4 + $0x1a0] sm:$0xff]  ;;  %v1284_v62 = vpack.c.bf16 %v382_v58, %v381_v57  ;;  %v392_v24 = vld [vmem:[#allocation4 + $0x178] sm:$0xff]  ;;  %v574_v48 = vld [vmem:[#allocation2 + $0x110] sm:$0xff] }
  0x67   :  { %1223 = vmatprep.subr.bf16.mxu1 %v1513_v1  ;;  %v1260_v3 = vpack.c.bf16 %v398_v61, %v397_v60  ;;  %v1299_v25 = vpack.c.bf16 %v392_v24, %v391_v23  ;;  %v405_v30 = vld [vmem:[#allocation4 + $0x1e0] sm:$0xff]  ;;  %v408_v34 = vld [vmem:[#allocation4 + $0x1f8] sm:$0xff]  ;;  %v578_v54 = vld [vmem:[#allocation2 + $0x130] sm:$0xff] }
  0x68   :  { %v1275_v37 = vpack.c.bf16 %v408_v34, %v407_v32  ;;  %v572_v47 = vld [vmem:[#allocation2 + $0x100] sm:$0xff]  ;;  %v579_v50 = vld [vmem:[#allocation2 + $0x138] sm:$0xff]  ;;  %v582_v61 = vld [vmem:[#allocation2 + $0x150] sm:$0xff] }
  0x69   :  { %1204 = vmatpush1.bf16.msra.mxu0 %v1203_v2  ;;  %v384_v2 = vld [vmem:[#allocation4 + $0x138] sm:$0xff]  ;;  %v1303_v51 = vpack.c.bf16 %v574_v48, %v572_v47  ;;  %v580_v60 = vld [vmem:[#allocation2 + $0x140] sm:$0xff]  ;;  %v602_v34 = vld [vmem:[#allocation2 + $0x1f0] sm:$0xff] }
  0x6a   :  { %1229 = vmatprep.subr.bf16.mxu0 %v1513_v1  ;;  %1225 = vmatpush3.bf16.msra.mxu1 %v1224_v31  ;;  %v1287_v7 = vpack.c.bf16 %v384_v2, %v383_v63  ;;  %v406_v31 = vld [vmem:[#allocation4 + $0x1e8] sm:$0xff]  ;;  %v583_v57 = vld [vmem:[#allocation2 + $0x158] sm:$0xff]  ;;  %v1311_v2 = vpack.c.bf16 %v582_v61, %v580_v60  ;;  %v562_v48 = vld [vmem:[#allocation4 + $0x230] sm:$0xff] }
  0x6b   :  { %1226 = vmatprep.subr.bf16.mxu1 %v1513_v1  ;;  %v1272_v33 = vpack.c.bf16 %v406_v31, %v405_v30  ;;  %v587_v63 = vld [vmem:[#allocation2 + $0x178] sm:$0xff] }
  0x6c   :  { %185 = vmatmul.mubr.f32.vlgmr.msra.gmra.mrb[0].mxu0 %v75_v5  ;;  %v400_v5 = vld [vmem:[#allocation4 + $0x1b8] sm:$0xff] }
  0x6d   :  { %1231 = vmatpush3.bf16.msra.mxu0 %v1230_v6  ;;  %1065 = vmatprep.mubr.msk.f32.mxu0 %vm1514_vm0, %v1512_v0  ;;  %v116_v6 = vsub.s32 1, %v1632_v38  ;;  %v1263_v10 = vpack.c.bf16 %v400_v5, %v399_v4  ;;  %v584_v4 = vld [vmem:[#allocation2 + $0x160] sm:$0xff]  ;;  %v586_v5 = vld [vmem:[#allocation2 + $0x170] sm:$0xff]  ;;  %v603_v30 = vld [vmem:[#allocation2 + $0x1f8] sm:$0xff] }
  0x6e   :  { %1232 = vmatprep.subr.bf16.mxu0 %v1513_v1  ;;  %1228 = vmatpush3.bf16.msra.mxu1 %v1227_v36  ;;  %v575_v36 = vld [vmem:[#allocation2 + $0x118] sm:$0xff] }
  0x6f   :  { %1253 = vmatprep.subr.bf16.mxu1 %v1513_v1  ;;  %v117_v13 = vrot.slane %v108_v40, %v116_v6  ;;  %v567_v60 = vld [vmem:[#allocation4 + $0x258] sm:$0xff] }
  0x71   :  { %1234 = vmatpush3.bf16.msra.mxu0 %v1233_v9  ;;  %v386_v9 = vld [vmem:[#allocation4 + $0x148] sm:$0xff] }
  0x72   :  { %1235 = vmatprep.subr.bf16.mxu0 %v1513_v1  ;;  %v1290_v14 = vpack.c.bf16 %v386_v9, %v385_v8  ;;  %v591_v8 = vld [vmem:[#allocation2 + $0x198] sm:$0xff]  ;;  %v1315_v9 = vpack.c.bf16 %v586_v5, %v584_v4  ;;  %v568_v5 = vld [vmem:[#allocation4 + $0x260] sm:$0xff] }
  0x73   :  { %v691_v4 = vld [vmem:[#allocation4 + $0x298] sm:$0xff] }
  0x75   :  { %1237 = vmatpush3.bf16.msra.mxu0 %v1236_v12  ;;  %v402_v12 = vld [vmem:[#allocation4 + $0x1c8] sm:$0xff] }
  0x76   :  { %1238 = vmatprep.subr.bf16.mxu0 %v1513_v1  ;;  %v1266_v17 = vpack.c.bf16 %v402_v12, %v401_v11  ;;  %v588_v11 = vld [vmem:[#allocation2 + $0x180] sm:$0xff]  ;;  %v590_v12 = vld [vmem:[#allocation2 + $0x190] sm:$0xff] }
  0x79   :  { %1240 = vmatpush3.bf16.msra.mxu0 %v1239_v15  ;;  %v387_v15 = vld [vmem:[#allocation4 + $0x150] sm:$0xff] }
  0x7a   :  { %1241 = vmatprep.subr.bf16.mxu0 %v1513_v1  ;;  %v1293_v19 = vpack.c.bf16 %v388_v16, %v387_v15  ;;  %v1319_v15 = vpack.c.bf16 %v590_v12, %v588_v11  ;;  %v874_v16 = vld [vmem:[#allocation7] ss:$0 sm:$0xff]  ;;  %v709_v11 = vld [vmem:[#allocation4 + $0x328] sm:$0xff] }
  0x7b   :  { %v692_v12 = vld [vmem:[#allocation4 + $0x2a0] sm:$0xff] }
  0x7d   :  { %1243 = vmatpush3.bf16.msra.mxu0 %v1242_v18 }
  0x7e   :  { %1244 = vmatprep.subr.bf16.mxu0 %v1513_v1 }
  0x81   :  { %1246 = vmatpush3.bf16.msra.mxu0 %v1245_v21  ;;  %v390_v21 = vld [vmem:[#allocation4 + $0x168] sm:$0xff] }
  0x82   :  { %1247 = vmatprep.subr.bf16.mxu0 %v1513_v1  ;;  %v1296_v22 = vpack.c.bf16 %v390_v21, %v389_v20  ;;  %v597_v20 = vld [vmem:[#allocation2 + $0x1c8] sm:$0xff]  ;;  %v599_v21 = vld [vmem:[#allocation2 + $0x1d8] sm:$0xff] }
  0x85   :  { %1249 = vmatpush3.bf16.msra.mxu0 %v1248_v27  ;;  %v403_v27 = vld [vmem:[#allocation4 + $0x1d0] sm:$0xff] }
  0x86   :  { %1250 = vmatprep.subr.bf16.mxu0 %v1513_v1  ;;  %v1269_v29 = vpack.c.bf16 %v404_v28, %v403_v27  ;;  %v596_v27 = vld [vmem:[#allocation2 + $0x1c0] sm:$0xff]  ;;  %v598_v28 = vld [vmem:[#allocation2 + $0x1d0] sm:$0xff] }
  0x87   :  { %v1327_v31 = vpack.c.bf16 %v598_v28, %v596_v27  ;;  %v713_v27 = vld [vmem:[#allocation4 + $0x348] sm:$0xff]  ;;  %v696_v28 = vld [vmem:[#allocation4 + $0x2c0] sm:$0xff] }
  0x89   :  { %1252 = vmatpush3.bf16.msra.mxu0 %v1251_v35  ;;  %v573_v35 = vld [vmem:[#allocation2 + $0x108] sm:$0xff] }
  0x8a   :  { %1277 = vmatprep.subr.bf16.mxu0 %v1513_v1  ;;  %v1301_v40 = vpack.c.bf16 %v575_v36, %v573_v35  ;;  %v556_v36 = vld [vmem:[#allocation4 + $0x200] sm:$0xff] }
 0x13f   :  { %v186_v42 = vpop.f32.mrb[0].mxu0 }
 0x140   :  { %v187_v43 = vadd.f32 %v186_v42, %v113_v41  ;;  %v188_v44 = vpop.f32.mrb[1].mxu0  ;;  %v875_v41 = vld [vmem:[#allocation7 + $0x8] ss:$0 sm:$0xff] }
 0x141   :  { %v189_v18 = vadd.f32 %v188_v44, %v117_v13  ;;  %v593_v13 = vld [vmem:[#allocation2 + $0x1a8] sm:$0xff] }
 0x142   :  { %1400 = vtanh.f32 %v187_v43 }
 0x143   :  { %1402 = vtanh.f32 %v189_v18  ;;  %v592_v18 = vld [vmem:[#allocation2 + $0x1a0] sm:$0xff] }
 0x14c   :  { %v1401_v53 = vpop.eup %1400 }
 0x14d   :  { %1031 = vmatmul.mubr.f32.vlgmr.msra.gmra.mrb[0].mxu1 %v1401_v53  ;;  %1066 = vmatmul.mubr.f32.vlgmr.msra.gmra.mrb[2].mxu0 %v1401_v53  ;;  %v1403_v26 = vpop.eup %1402  ;;  %v576_v53 = vld [vmem:[#allocation2 + $0x120] sm:$0xff] }
 0x14e   :  { %1279 = vmatpush3.bf16.msra.mxu0 %v1278_v49  ;;  %1135 = vmatprep.mubr.msk.f32.mxu0 %vm1514_vm0, %v1512_v0  ;;  %v577_v49 = vld [vmem:[#allocation2 + $0x128] sm:$0xff]  ;;  %v1307_v58 = vpack.c.bf16 %v578_v54, %v576_v53  ;;  %v704_v53 = vld [vmem:[#allocation4 + $0x300] sm:$0xff] }
 0x14f   :  { %1280 = vmatprep.subr.bf16.mxu0 %v1513_v1  ;;  %1255 = vmatpush3.bf16.msra.mxu1 %v1254_v52  ;;  %v1305_v52 = vpack.c.bf16 %v579_v50, %v577_v49  ;;  %v563_v49 = vld [vmem:[#allocation4 + $0x238] sm:$0xff]  ;;  %v705_v54 = vld [vmem:[#allocation4 + $0x308] sm:$0xff] }
 0x150   :  { %1256 = vmatprep.subr.bf16.mxu1 %v1513_v1  ;;  %1100 = vmatprep.mubr.msk.f32.mxu1 %vm1514_vm0, %v1512_v0  ;;  %v1375_v50 = vpack.c.bf16 %v563_v49, %v562_v48  ;;  %v702_v48 = vld [vmem:[#allocation4 + $0x2f0] sm:$0xff]  ;;  %v703_v49 = vld [vmem:[#allocation4 + $0x2f8] sm:$0xff] }
 0x152   :  { %1282 = vmatpush3.bf16.msra.mxu0 %v1281_v56  ;;  %v581_v56 = vld [vmem:[#allocation2 + $0x148] sm:$0xff] }
 0x153   :  { %1283 = vmatprep.subr.bf16.mxu0 %v1513_v1  ;;  %1258 = vmatpush3.bf16.msra.mxu1 %v1257_v59  ;;  %v1309_v59 = vpack.c.bf16 %v583_v57, %v581_v56  ;;  %v688_v56 = vld [vmem:[#allocation4 + $0x280] sm:$0xff]  ;;  %v689_v57 = vld [vmem:[#allocation4 + $0x288] sm:$0xff] }
 0x154   :  { %1259 = vmatprep.subr.bf16.mxu1 %v1513_v1 }
 0x156   :  { %1285 = vmatpush3.bf16.msra.mxu0 %v1284_v62  ;;  %v585_v62 = vld [vmem:[#allocation2 + $0x168] sm:$0xff] }
 0x157   :  { %1286 = vmatprep.subr.bf16.mxu0 %v1513_v1  ;;  %1261 = vmatpush3.bf16.msra.mxu1 %v1260_v3  ;;  %v1313_v3 = vpack.c.bf16 %v587_v63, %v585_v62  ;;  %v706_v62 = vld [vmem:[#allocation4 + $0x310] sm:$0xff]  ;;  %v707_v63 = vld [vmem:[#allocation4 + $0x318] sm:$0xff] }
 0x158   :  { %1262 = vmatprep.subr.bf16.mxu1 %v1513_v1 }
 0x15a   :  { %1288 = vmatpush3.bf16.msra.mxu0 %v1287_v7  ;;  %v589_v7 = vld [vmem:[#allocation2 + $0x188] sm:$0xff] }
 0x15b   :  { %1289 = vmatprep.subr.bf16.mxu0 %v1513_v1  ;;  %1264 = vmatpush3.bf16.msra.mxu1 %v1263_v10  ;;  %v1317_v10 = vpack.c.bf16 %v591_v8, %v589_v7  ;;  %v569_v7 = vld [vmem:[#allocation4 + $0x268] sm:$0xff] }
 0x15c   :  { %1265 = vmatprep.subr.bf16.mxu1 %v1513_v1 }
 0x15e   :  { %1291 = vmatpush3.bf16.msra.mxu0 %v1290_v14  ;;  %v595_v14 = vld [vmem:[#allocation2 + $0x1b8] sm:$0xff] }
 0x15f   :  { %1292 = vmatprep.subr.bf16.mxu0 %v1513_v1  ;;  %1267 = vmatpush3.bf16.msra.mxu1 %v1266_v17  ;;  %v1321_v17 = vpack.c.bf16 %v595_v14, %v593_v13  ;;  %v693_v14 = vld [vmem:[#allocation4 + $0x2a8] sm:$0xff] }
 0x160   :  { %1268 = vmatprep.subr.bf16.mxu1 %v1513_v1 }
 0x162   :  { %1294 = vmatpush3.bf16.msra.mxu0 %v1293_v19  ;;  %v594_v19 = vld [vmem:[#allocation2 + $0x1b0] sm:$0xff] }
 0x163   :  { %1295 = vmatprep.subr.bf16.mxu0 %v1513_v1  ;;  %1270 = vmatpush3.bf16.msra.mxu1 %v1269_v29  ;;  %v1323_v24 = vpack.c.bf16 %v594_v19, %v592_v18  ;;  %v601_v29 = vld [vmem:[#allocation2 + $0x1e8] sm:$0xff]  ;;  %v711_v18 = vld [vmem:[#allocation4 + $0x338] sm:$0xff]  ;;  %v1343_v19 = vpack.c.bf16 %v693_v14, %v692_v12 }
 0x164   :  { %1271 = vmatprep.subr.bf16.mxu1 %v1513_v1  ;;  %v1329_v32 = vpack.c.bf16 %v603_v30, %v601_v29  ;;  %v697_v30 = vld [vmem:[#allocation4 + $0x2c8] sm:$0xff] }
 0x166   :  { %1297 = vmatpush3.bf16.msra.mxu0 %v1296_v22 }
 0x167   :  { %1298 = vmatprep.subr.bf16.mxu0 %v1513_v1  ;;  %1273 = vmatpush3.bf16.msra.mxu1 %v1272_v33  ;;  %v600_v33 = vld [vmem:[#allocation2 + $0x1e0] sm:$0xff] }
 0x168   :  { %1274 = vmatprep.subr.bf16.mxu1 %v1513_v1  ;;  %v1331_v35 = vpack.c.bf16 %v602_v34, %v600_v33  ;;  %v1351_v33 = vpack.c.bf16 %v697_v30, %v696_v28 }
 0x16a   :  { %1300 = vmatpush3.bf16.msra.mxu0 %v1299_v25 }
 0x16b   :  { %1276 = vmatpush3.bf16.msra.mxu1 %v1275_v37  ;;  %v557_v37 = vld [vmem:[#allocation4 + $0x208] sm:$0xff] }
 0x16c   :  { %1302 = vmatprep.subr.bf16.mxu1 %v1301_v40  ;;  %v1366_v40 = vpack.c.bf16 %v557_v37, %v556_v36  ;;  %v699_v36 = vld [vmem:[#allocation4 + $0x2d8] sm:$0xff]  ;;  %v717_v37 = vld [vmem:[#allocation4 + $0x368] sm:$0xff] }
 0x16d   :  { %1136 = vmatmul.mubr.f32.vlgmr.msra.gmra.mrb[4].mxu0 %v1403_v26  ;;  %v1325_v26 = vpack.c.bf16 %v599_v21, %v597_v20 }
 0x220   :  { %v280_v42 = vpop.f32.mrb[0].mxu1  ;;  %v372_v43 = vpop.f32.mrb[2].mxu0 }
 0x221   :  { %v373_v44 = vadd.f32 %v875_v41, %v372_v43  ;;  %v1032_v45 = vpop.f32.mrb[1].mxu1  ;;  %v1067_v46 = vpop.f32.mrb[3].mxu0  ;;  %v281_v22 = vadd.f32 %v874_v16, %v280_v42  ;;  %v558_v41 = vld [vmem:[#allocation4 + $0x210] sm:$0xff]  ;;  %v559_v42 = vld [vmem:[#allocation4 + $0x218] sm:$0xff] }
 0x222   :  { %v560_v45 = vld [vmem:[#allocation4 + $0x220] sm:$0xff]  ;;  %v561_v46 = vld [vmem:[#allocation4 + $0x228] sm:$0xff]  ;;  %v571_v16 = vld [vmem:[#allocation4 + $0x278] sm:$0xff] }
 0x223   :  { %1404 = vtanh.f32 %v373_v44  ;;  %v1369_v44 = vpack.c.bf16 %v559_v42, %v558_v41  ;;  %v1372_v47 = vpack.c.bf16 %v561_v46, %v560_v45  ;;  %v700_v42 = vld [vmem:[#allocation4 + $0x2e0] sm:$0xff]  ;;  %v718_v45 = vld [vmem:[#allocation4 + $0x370] sm:$0xff]  ;;  %v719_v46 = vld [vmem:[#allocation4 + $0x378] sm:$0xff] }
 0x224   :  { %1406 = vtanh.f32 %v281_v22  ;;  %v694_v22 = vld [vmem:[#allocation4 + $0x2b0] sm:$0xff] }
 0x22d   :  { %v1405_v55 = vpop.eup %1404 }
 0x22e   :  { %1101 = vmatmul.mubr.f32.vlgmr.msra.gmra.mrb[2].mxu1 %v1405_v55  ;;  %v1407_v43 = vpop.eup %1406  ;;  %v1333_v55 = vpack.c.bf16 %v705_v54, %v704_v53 }
 0x22f   :  { %1304 = vmatpush1.bf16.msra.mxu1 %v1303_v51  ;;  %681 = vmatprep.mubr.f32.mxu1 %v1512_v0  ;;  %v564_v51 = vld [vmem:[#allocation4 + $0x240] sm:$0xff] }
 0x230   :  { %1306 = vmatprep.subr.bf16.mxu1 %v1305_v52  ;;  %v565_v52 = vld [vmem:[#allocation4 + $0x248] sm:$0xff]  ;;  %1334 = vmatprep.subr.bf16.mxu0 %v1333_v55 }
 0x233   :  { %1308 = vmatpush1.bf16.msra.mxu1 %v1307_v58  ;;  %v566_v58 = vld [vmem:[#allocation4 + $0x250] sm:$0xff] }
 0x234   :  { %1310 = vmatprep.subr.bf16.mxu1 %v1309_v59  ;;  %v1335_v59 = vpack.c.bf16 %v689_v57, %v688_v56  ;;  %v1381_v61 = vpack.c.bf16 %v567_v60, %v566_v58  ;;  %v605_v56 = vld [vmem:[#allocation6 + $0x10] ss:$8 sm:$0x3] }
 0x235   :  { %v614_v57 = vrot.slane %v605_v56, %v116_v6  ;;  %v610_v58 = vrot.slane %v605_v56, %v112_v39 }
 0x236   :  { %1336 = vmatpush3.bf16.msra.mxu0 %v1335_v59 }
 0x237   :  { %1312 = vmatpush1.bf16.msra.mxu1 %v1311_v2  ;;  %v690_v2 = vld [vmem:[#allocation4 + $0x290] sm:$0xff] }
 0x238   :  { %1314 = vmatprep.subr.bf16.mxu1 %v1313_v3  ;;  %v1337_v3 = vpack.c.bf16 %v707_v63, %v706_v62  ;;  %v1339_v8 = vpack.c.bf16 %v691_v4, %v690_v2 }
 0x23a   :  { %1338 = vmatprep.subr.bf16.mxu0 %v1337_v3 }
 0x23b   :  { %1316 = vmatpush1.bf16.msra.mxu1 %v1315_v9  ;;  %v1384_v9 = vpack.c.bf16 %v569_v7, %v568_v5  ;;  %1340 = vmatpush3.bf16.msra.mxu0 %v1339_v8  ;;  %v877_v5 = vld [vmem:[#allocation7 + $0x18] ss:$0 sm:$0xff] }
 0x23c   :  { %1318 = vmatprep.subr.bf16.mxu1 %v1317_v10  ;;  %v708_v10 = vld [vmem:[#allocation4 + $0x320] sm:$0xff] }
 0x23d   :  { %v1341_v13 = vpack.c.bf16 %v709_v11, %v708_v10 }
 0x23f   :  { %1320 = vmatpush1.bf16.msra.mxu1 %v1319_v15  ;;  %v570_v15 = vld [vmem:[#allocation4 + $0x270] sm:$0xff]  ;;  %1342 = vmatprep.subr.bf16.mxu0 %v1341_v13 }
 0x240   :  { %v1659_v23 = vpop.f32.mrb[4].mxu0  ;;  %1322 = vmatprep.subr.bf16.mxu1 %v1321_v17  ;;  %v710_v17 = vld [vmem:[#allocation4 + $0x330] sm:$0xff]  ;;  %v1387_v20 = vpack.c.bf16 %v571_v16, %v570_v15  ;;  %1344 = vmatpush3.bf16.msra.mxu0 %v1343_v19 }
 0x241   :  { %v1137_v25 = vpop.f32.mrb[5].mxu0  ;;  %v1345_v21 = vpack.c.bf16 %v711_v18, %v710_v17 }
 0x243   :  { %1324 = vmatpush1.bf16.msra.mxu1 %v1323_v24  ;;  %1346 = vmatprep.subr.bf16.mxu0 %v1345_v21  ;;  %v695_v24 = vld [vmem:[#allocation4 + $0x2b8] sm:$0xff] }
 0x244   :  { %1326 = vmatprep.subr.bf16.mxu1 %v1325_v26  ;;  %v1347_v25 = vpack.c.bf16 %v695_v24, %v694_v22  ;;  %v712_v26 = vld [vmem:[#allocation4 + $0x340] sm:$0xff] }
 0x245   :  { %v1349_v29 = vpack.c.bf16 %v713_v27, %v712_v26 }
 0x246   :  { %1348 = vmatpush3.bf16.msra.mxu0 %v1347_v25 }
 0x247   :  { %1328 = vmatpush1.bf16.msra.mxu1 %v1327_v31  ;;  %v714_v31 = vld [vmem:[#allocation4 + $0x350] sm:$0xff]  ;;  %1350 = vmatprep.subr.bf16.mxu0 %v1349_v29 }
 0x248   :  { %1330 = vmatprep.subr.bf16.mxu1 %v1329_v32  ;;  %v715_v32 = vld [vmem:[#allocation4 + $0x358] sm:$0xff] }
 0x249   :  { %v1353_v34 = vpack.c.bf16 %v715_v32, %v714_v31 }
 0x24a   :  { %1352 = vmatpush3.bf16.msra.mxu0 %v1351_v33 }
 0x24b   :  { %1332 = vmatpush1.bf16.msra.mxu1 %v1331_v35  ;;  %v698_v35 = vld [vmem:[#allocation4 + $0x2d0] sm:$0xff]  ;;  %1354 = vmatprep.subr.bf16.mxu0 %v1353_v34 }
 0x24c   :  { %1365 = vmatprep.subr.bf16.mxu1 %v1513_v1 }
 0x24e   :  { %682 = vmatmul.mubr.f32.vlgmr.msra.gmra.mrb[4].mxu1 %v1407_v43  ;;  %v701_v43 = vld [vmem:[#allocation4 + $0x2e8] sm:$0xff] }
 0x24f   :  { %1367 = vmatpush3.bf16.msra.mxu1 %v1366_v40  ;;  %1170 = vmatprep.mubr.msk.f32.mxu1 %vm1514_vm0, %v1512_v0  ;;  %v1378_v0 = vpack.c.bf16 %v565_v52, %v564_v51  ;;  %v1355_v40 = vpack.c.bf16 %v699_v36, %v698_v35  ;;  %v876_v52 = vld [vmem:[#allocation7 + $0x10] ss:$0 sm:$0xff] }
 0x250   :  { %1368 = vmatprep.subr.bf16.mxu1 %v1513_v1 }
 0x251   :  { %1356 = vmatpush3.bf16.msra.mxu0 %v1355_v40 }
 0x253   :  { %1370 = vmatpush3.bf16.msra.mxu1 %v1369_v44  ;;  %v1359_v44 = vpack.c.bf16 %v701_v43, %v700_v42 }
 0x254   :  { %1371 = vmatprep.subr.bf16.mxu1 %v1513_v1 }
 0x257   :  { %1373 = vmatpush3.bf16.msra.mxu1 %v1372_v47  ;;  %v1361_v47 = vpack.c.bf16 %v719_v46, %v718_v45 }
 0x258   :  { %1374 = vmatprep.subr.bf16.mxu1 %v1513_v1 }
 0x25b   :  { %1376 = vmatpush3.bf16.msra.mxu1 %v1375_v50  ;;  %v1363_v50 = vpack.c.bf16 %v703_v49, %v702_v48 }
 0x25c   :  { %1377 = vmatprep.subr.bf16.mxu1 %v1513_v1 }
 0x25f   :  { %1379 = vmatpush3.bf16.msra.mxu1 %v1378_v0 }
 0x260   :  { %1380 = vmatprep.subr.bf16.mxu1 %v1513_v1 }
 0x263   :  { %1382 = vmatpush3.bf16.msra.mxu1 %v1381_v61 }
 0x264   :  { %1383 = vmatprep.subr.bf16.mxu1 %v1513_v1 }
 0x267   :  { %1385 = vmatpush3.bf16.msra.mxu1 %v1384_v9 }
 0x268   :  { %1386 = vmatprep.subr.bf16.mxu1 %v1513_v1  ;;  %v716_v1 = vld [vmem:[#allocation4 + $0x360] sm:$0xff] }
 0x269   :  { %v1357_v41 = vpack.c.bf16 %v717_v37, %v716_v1 }
 0x26b   :  { %1388 = vmatpush3.bf16.msra.mxu1 %v1387_v20  ;;  %1358 = vmatprep.subr.bf16.mxu0 %v1357_v41 }
 0x26c   :  { %1360 = vmatpush3.bf16.msra.mxu0 %v1359_v44 }
 0x26d   :  { %1362 = vmatprep.subr.bf16.mxu0 %v1361_v47 }
 0x270   :  { %1364 = vmatpush3.bf16.msra.mxu0 %v1363_v50 }
 0x301   :  { %v475_v51 = vpop.f32.mrb[2].mxu1 }
 0x302   :  { %v546_v0 = vadd.f32 %v1659_v23, %v475_v51  ;;  %v1102_v53 = vpop.f32.mrb[3].mxu1 }
 0x304   :  { %v554_v54 = vadd.f32 %v876_v52, %v546_v0 }
 0x306   :  { %1408 = vtanh.f32 %v554_v54 }
 0x310   :  { %v1409_v55 = vpop.eup %1408 }
 0x311   :  { %1171 = vmatmul.mubr.f32.vlgmr.msra.gmra.mrb[6].mxu1 %v1409_v55 }
 0x321   :  { %v683_v59 = vpop.f32.mrb[4].mxu1 }
 0x322   :  { %v685_v60 = vpop.f32.mrb[5].mxu1  ;;  %v684_v62 = vadd.f32 %v683_v59, %v610_v58 }
 0x323   :  { %v686_v61 = vadd.f32 %v685_v60, %v614_v57 }
 0x325   :  { %784 = vmatprep.mubr.f32.mxu0 %v686_v61 }
 0x326   :  { %785 = vmatmul.mubr.f32.vlgmr.msra.gmra.mrb[6].mxu0 %v684_v62 }
 0x3e4   :  { %v856_v63 = vpop.f32.mrb[6].mxu1 }
 0x3e5   :  { %v1172_v23 = vpop.f32.mrb[7].mxu1 }
 0x3f9   :  { %v978_v2 = vpop.f32.mrb[6].mxu0 }
 0x3fa   :  { %v979_v3 = vpop.f32.mrb[7].mxu0 }
 0x3fb   :  { %v980_v4 = vadd.f32 %v979_v3, %v978_v2 }
 0x3fd   :  { %v857_v7 = vadd.f32 %v980_v4, %v856_v63 }
 0x3ff   :  { %v865_v8 = vadd.f32 %v877_v5, %v857_v7 }
 0x401   :  { %866 = vst [vmem:[%s1684_s5] sm:$0xff] %v865_v8 }
 0x402   :  { %871 = vsyncpa [#allocation3], 1 }
 0x403   :  { %872 = vsyncpa [#allocation5], 1 }
 0x404   :  { %873 = vsyncpa [#allocation8], 1 }

</bundles_post_ra>
